<compile_context>
chip_gen: v5e
topology: v5e:2x2
jax: 0.10.0
libtpu: 0.0.40
codegen_flags: <defaults>
</compile_context>

<pallas_src>
import functools

import jax
import jax.numpy as jnp
from jax.experimental import pallas as pl
from jax.experimental.pallas import tpu as pltpu

_LANE = 128
_SUBLANE = 8


def _round_up(x, m):
    return (x + m - 1) // m * m


def _pad2(a, rows, cols):
    r, c = a.shape
    return jnp.pad(a, ((0, rows - r), (0, cols - c)))


def prepare_params(w1, b1, w2, b2, w3, b3):
    """Pad hidden dims to 128 lanes and cast weights to bf16, once at init."""
    d_in, h1 = w1.shape
    h2 = w2.shape[1]
    d_out = w3.shape[1]
    h1_p = _round_up(h1, _LANE)
    h2_p = _round_up(h2, _LANE)
    # Input dim of w1 and output dim of w3 stay at their true sizes so x and the
    # output need no padding.  Zero rows/cols contribute nothing through the matmuls.
    w1_p = _pad2(w1, d_in, h1_p).astype(jnp.bfloat16)
    w2_p = _pad2(w2, h1_p, h2_p).astype(jnp.bfloat16)
    w3_p = _pad2(w3, h2_p, d_out).astype(jnp.bfloat16)
    b1_p = _pad2(b1, 1, h1_p).astype(jnp.float32)   # biases stay f32 (f32 elementwise)
    b2_p = _pad2(b2, 1, h2_p).astype(jnp.float32)
    b3_p = b3.astype(jnp.float32)                   # (1, d_out), unpadded
    return w1_p, b1_p, w2_p, b2_p, w3_p, b3_p


def mlp_kernel(x_ref, w1_ref, b1_ref, w2_ref, b2_ref, w3_ref, b3_ref, o_ref):
    # x tile: (TB, d_in); weights are bf16, biases f32, all VMEM-resident across steps.
    x = x_ref[...].astype(jnp.bfloat16)

    # fc1 + ReLU: bf16 MXU operands, f32 accumulate, f32 bias/ReLU.
    h1 = jnp.dot(x, w1_ref[...], preferred_element_type=jnp.float32) + b1_ref[...]
    h1 = jnp.maximum(h1, 0.0)

    # fc2 + ReLU
    h2 = jnp.dot(h1.astype(jnp.bfloat16), w2_ref[...],
                 preferred_element_type=jnp.float32) + b2_ref[...]
    h2 = jnp.maximum(h2, 0.0)

    # fc3 + sigmoid (exp on the EUP; no explicit VALU divide)
    z = jnp.dot(h2.astype(jnp.bfloat16), w3_ref[...],
                preferred_element_type=jnp.float32) + b3_ref[...]
    o_ref[...] = jax.nn.sigmoid(z).astype(o_ref.dtype)


@functools.partial(jax.jit, static_argnames=("block_batch",))
def mlp_forward(x, w1_p, b1_p, w2_p, b2_p, w3_p, b3_p, *, block_batch=None):
    batch, d_in = x.shape
    h1_p = w1_p.shape[1]
    h2_p = w2_p.shape[1]
    d_out = w3_p.shape[1]

    # Batch tile: multiple of 8 sublanes, capped at 512, aiming for >= 2 grid blocks
    # so both v7x TensorCores get work when batch >= 16.
    if block_batch is None:
        block_batch = min(512, _round_up(max(1, pl.cdiv(batch, 2)), _SUBLANE))
    tb = _round_up(block_batch, _SUBLANE)
    n_blocks = pl.cdiv(batch, tb)   # ragged final block: reads are harmless,
                                    # out-of-bounds writes are masked by Pallas.

    # VMEM budget: resident weights/biases (x2: pipeline buffers are allocated even
    # for constant index_maps) + double-buffered x/out tiles + f32/bf16 intermediates.
    f32, bf16 = 4, 2
    weights_bytes = 2 * ((d_in * h1_p + h1_p * h2_p + h2_p * d_out) * bf16
                         + (h1_p + h2_p + d_out) * f32)
    io_bytes = 2 * (tb * d_in + tb * d_out) * f32            # 2-deep x/out pipeline
    interm_bytes = (tb * h1_p + tb * h2_p) * (f32 + bf16) + tb * d_in * bf16
    vmem_limit = int(min(max(2 * (weights_bytes + io_bytes + interm_bytes),
                             16 * 1024 * 1024),
                         48 * 1024 * 1024))

    cost = pl.CostEstimate(
        flops=2 * batch * (d_in * h1_p + h1_p * h2_p + h2_p * d_out),
        transcendentals=batch * d_out,
        bytes_accessed=(batch * d_in * f32 + batch * d_out * f32
                        + (d_in * h1_p + h1_p * h2_p + h2_p * d_out) * bf16
                        + (h1_p + h2_p + d_out) * f32),
    )

    resident = lambda shape: pl.BlockSpec(shape, lambda i: (0,) * len(shape))

    out = pl.pallas_call(
        mlp_kernel,
        out_shape=jax.ShapeDtypeStruct((batch, d_out), jnp.float32),
        grid=(n_blocks,),
        in_specs=[
            pl.BlockSpec((tb, d_in), lambda i: (i, 0)),     # x: tiled over batch, true width
            resident(w1_p.shape), resident(b1_p.shape),     # weights/biases resident
            resident(w2_p.shape), resident(b2_p.shape),
            resident(w3_p.shape), resident(b3_p.shape),
        ],
        out_specs=pl.BlockSpec((tb, d_out), lambda i: (i, 0)),
        compiler_params=pltpu.CompilerParams(
            dimension_semantics=("parallel",),              # megacore-shard the batch axis
            vmem_limit_bytes=vmem_limit,
        ),
        cost_estimate=cost,
    )(x, w1_p, b1_p, w2_p, b2_p, w3_p, b3_p)

    return out


def init_linear(key, in_features, out_features):
    # PyTorch nn.Linear default init: U(-1/sqrt(in), 1/sqrt(in)) for W and b.
    kw, kb = jax.random.split(key)
    bound = 1.0 / jnp.sqrt(jnp.float32(in_features))
    # stored as (in, out) == transpose of torch's (out, in)
    w = jax.random.uniform(kw, (in_features, out_features), jnp.float32, -bound, bound)
    b = jax.random.uniform(kb, (1, out_features), jnp.float32, -bound, bound)
    return w, b


if __name__ == "__main__":
    # Small shapes consistent with MLP(input_shape, output_shape, layers):
    # input_shape=32, layers=[64, 32], output_shape=16, batch=8
    batch, input_shape, output_shape = 8, 32, 16
    layers = (64, 32)

    key = jax.random.PRNGKey(0)
    kx, k1, k2, k3 = jax.random.split(key, 4)

    x = jax.random.normal(kx, (batch, input_shape), jnp.float32)
    w1, b1 = init_linear(k1, input_shape, layers[0])
    w2, b2 = init_linear(k2, layers[0], layers[1])
    w3, b3 = init_linear(k3, layers[1], output_shape)

    # Pad + bf16-cast the weights once, outside the per-call path.
    params = prepare_params(w1, b1, w2, b2, w3, b3)

    out = mlp_forward(x, *params)
    out = jax.block_until_ready(out)

    # Pure-JAX f32 reference check (bf16 MXU operands -> loosened tolerance).
    h1 = jnp.maximum(x @ w1 + b1, 0.0)
    h2 = jnp.maximum(h1 @ w2 + b2, 0.0)
    ref = jax.nn.sigmoid(h2 @ w3 + b3)
    assert out.shape == (batch, output_shape)
    assert jnp.allclose(out, ref, atol=1e-2, rtol=1e-2), "mismatch vs reference"

    print("KERNEL_OK")
</pallas_src>

<mosaic_0001>
module attributes {stable_mosaic.version = 11 : i64} {
  func.func @mlp_kernel(%arg0: i32, %arg1: memref<8x32xf32, #tpu.memory_space<vmem>>, %arg2: memref<32x128xbf16, #tpu.memory_space<vmem>>, %arg3: memref<1x128xf32, #tpu.memory_space<vmem>>, %arg4: memref<128x128xbf16, #tpu.memory_space<vmem>>, %arg5: memref<1x128xf32, #tpu.memory_space<vmem>>, %arg6: memref<128x16xbf16, #tpu.memory_space<vmem>>, %arg7: memref<1x16xf32, #tpu.memory_space<vmem>>, %arg8: memref<8x16xf32, #tpu.memory_space<vmem>>) attributes {dimension_semantics = [#tpu.dimension_semantics<parallel>], iteration_bounds = array<i64: 1>, scalar_prefetch = 0 : i64, scratch_operands = 0 : i64, tpu.core_type = #tpu.core_type<tc>, window_params = [{transform_indices = @transform_0, window_bounds = array<i64: 8, 32>}, {pipeline_mode = #tpu.pipeline_mode<synchronous>, transform_indices = @transform_1, window_bounds = array<i64: 32, 128>}, {pipeline_mode = #tpu.pipeline_mode<synchronous>, transform_indices = @transform_2, window_bounds = array<i64: 1, 128>}, {pipeline_mode = #tpu.pipeline_mode<synchronous>, transform_indices = @transform_3, window_bounds = array<i64: 128, 128>}, {pipeline_mode = #tpu.pipeline_mode<synchronous>, transform_indices = @transform_4, window_bounds = array<i64: 1, 128>}, {pipeline_mode = #tpu.pipeline_mode<synchronous>, transform_indices = @transform_5, window_bounds = array<i64: 128, 16>}, {pipeline_mode = #tpu.pipeline_mode<synchronous>, transform_indices = @transform_6, window_bounds = array<i64: 1, 16>}, {transform_indices = @transform_7, window_bounds = array<i64: 8, 16>}]} {
    %c0 = arith.constant 0 : index
    %c0_0 = arith.constant 0 : index
    %0 = vector.load %arg1[%c0, %c0_0] : memref<8x32xf32, #tpu.memory_space<vmem>>, vector<8x32xf32>
    %1 = arith.truncf %0 : vector<8x32xf32> to vector<8x32xbf16>
    %c0_1 = arith.constant 0 : index
    %c0_2 = arith.constant 0 : index
    %2 = vector.load %arg2[%c0_1, %c0_2] : memref<32x128xbf16, #tpu.memory_space<vmem>>, vector<32x128xbf16>
    %cst = arith.constant dense<0.000000e+00> : vector<8x128xf32>
    %3 = tpu.matmul %1, %2, %cst {dimension_numbers = #tpu.dot_dimension_numbers<[1], [0], [0], [1], [0, 0, 1, 1], [], []>} : vector<8x32xbf16>, vector<32x128xbf16>, vector<8x128xf32> -> vector<8x128xf32>
    %c0_3 = arith.constant 0 : index
    %c0_4 = arith.constant 0 : index
    %4 = vector.load %arg3[%c0_3, %c0_4] : memref<1x128xf32, #tpu.memory_space<vmem>>, vector<1x128xf32>
    %5 = vector.broadcast %4 : vector<1x128xf32> to vector<8x128xf32>
    %6 = arith.addf %3, %5 : vector<8x128xf32>
    %cst_5 = arith.constant 0.000000e+00 : f32
    %7 = vector.broadcast %cst_5 : f32 to vector<8x128xf32>
    %8 = arith.maximumf %6, %7 : vector<8x128xf32>
    %9 = arith.truncf %8 : vector<8x128xf32> to vector<8x128xbf16>
    %c0_6 = arith.constant 0 : index
    %c0_7 = arith.constant 0 : index
    %10 = vector.load %arg4[%c0_6, %c0_7] : memref<128x128xbf16, #tpu.memory_space<vmem>>, vector<128x128xbf16>
    %cst_8 = arith.constant dense<0.000000e+00> : vector<8x128xf32>
    %11 = tpu.matmul %9, %10, %cst_8 {dimension_numbers = #tpu.dot_dimension_numbers<[1], [0], [0], [1], [0, 0, 1, 1], [], []>} : vector<8x128xbf16>, vector<128x128xbf16>, vector<8x128xf32> -> vector<8x128xf32>
    %c0_9 = arith.constant 0 : index
    %c0_10 = arith.constant 0 : index
    %12 = vector.load %arg5[%c0_9, %c0_10] : memref<1x128xf32, #tpu.memory_space<vmem>>, vector<1x128xf32>
    %13 = vector.broadcast %12 : vector<1x128xf32> to vector<8x128xf32>
    %14 = arith.addf %11, %13 : vector<8x128xf32>
    %cst_11 = arith.constant 0.000000e+00 : f32
    %15 = vector.broadcast %cst_11 : f32 to vector<8x128xf32>
    %16 = arith.maximumf %14, %15 : vector<8x128xf32>
    %17 = arith.truncf %16 : vector<8x128xf32> to vector<8x128xbf16>
    %c0_12 = arith.constant 0 : index
    %c0_13 = arith.constant 0 : index
    %18 = vector.load %arg6[%c0_12, %c0_13] : memref<128x16xbf16, #tpu.memory_space<vmem>>, vector<128x16xbf16>
    %cst_14 = arith.constant dense<0.000000e+00> : vector<8x16xf32>
    %19 = tpu.matmul %17, %18, %cst_14 {dimension_numbers = #tpu.dot_dimension_numbers<[1], [0], [0], [1], [0, 0, 1, 1], [], []>} : vector<8x128xbf16>, vector<128x16xbf16>, vector<8x16xf32> -> vector<8x16xf32>
    %c0_15 = arith.constant 0 : index
    %c0_16 = arith.constant 0 : index
    %20 = vector.load %arg7[%c0_15, %c0_16] : memref<1x16xf32, #tpu.memory_space<vmem>>, vector<1x16xf32>
    %21 = vector.broadcast %20 : vector<1x16xf32> to vector<8x16xf32>
    %22 = arith.addf %19, %21 : vector<8x16xf32>
    %23 = arith.negf %22 : vector<8x16xf32>
    %24 = math.exp %23 : vector<8x16xf32>
    %cst_17 = arith.constant 1.000000e+00 : f32
    %25 = vector.broadcast %cst_17 : f32 to vector<8x16xf32>
    %26 = arith.addf %25, %24 : vector<8x16xf32>
    %27 = arith.divf %25, %26 : vector<8x16xf32>
    %c0_18 = arith.constant 0 : index
    %c0_19 = arith.constant 0 : index
    %28 = vector.load %arg8[%c0_18, %c0_19] : memref<8x16xf32, #tpu.memory_space<vmem>>, vector<8x16xf32>
    tpu.vector_store %arg8[%c0_18, %c0_19], %27 {strides = array<i32>} : memref<8x16xf32, #tpu.memory_space<vmem>>, vector<8x16xf32>,
    return
  }
  func.func @transform_0(%arg0: i32) -> (i32, i32) {
    %c0_i32 = arith.constant 0 : i32
    %c0_i32_0 = arith.constant 0 : i32
    return %arg0, %c0_i32 : i32, i32
  }
  func.func @transform_1(%arg0: i32) -> (i32, i32) {
    %c0_i32 = arith.constant 0 : i32
    %c0_i32_0 = arith.constant 0 : i32
    %c0_i32_1 = arith.constant 0 : i32
    return %c0_i32, %c0_i32_0 : i32, i32
  }
  func.func @transform_2(%arg0: i32) -> (i32, i32) {
    %c0_i32 = arith.constant 0 : i32
    %c0_i32_0 = arith.constant 0 : i32
    %c0_i32_1 = arith.constant 0 : i32
    return %c0_i32, %c0_i32_0 : i32, i32
  }
  func.func @transform_3(%arg0: i32) -> (i32, i32) {
    %c0_i32 = arith.constant 0 : i32
    %c0_i32_0 = arith.constant 0 : i32
    %c0_i32_1 = arith.constant 0 : i32
    return %c0_i32, %c0_i32_0 : i32, i32
  }
  func.func @transform_4(%arg0: i32) -> (i32, i32) {
    %c0_i32 = arith.constant 0 : i32
    %c0_i32_0 = arith.constant 0 : i32
    %c0_i32_1 = arith.constant 0 : i32
    return %c0_i32, %c0_i32_0 : i32, i32
  }
  func.func @transform_5(%arg0: i32) -> (i32, i32) {
    %c0_i32 = arith.constant 0 : i32
    %c0_i32_0 = arith.constant 0 : i32
    %c0_i32_1 = arith.constant 0 : i32
    return %c0_i32, %c0_i32_0 : i32, i32
  }
  func.func @transform_6(%arg0: i32) -> (i32, i32) {
    %c0_i32 = arith.constant 0 : i32
    %c0_i32_0 = arith.constant 0 : i32
    %c0_i32_1 = arith.constant 0 : i32
    return %c0_i32, %c0_i32_0 : i32, i32
  }
  func.func @transform_7(%arg0: i32) -> (i32, i32) {
    %c0_i32 = arith.constant 0 : i32
    %c0_i32_0 = arith.constant 0 : i32
    return %arg0, %c0_i32 : i32, i32
  }
}

</mosaic_0001>

<bundles_post_ra>
// kernel: mlp_forward.1
= control target key start
LH: loop header
LB: loop body
LE: loop exit
PB: predicated region body
PF: predicated region fallthrough
CT: control target
= control target key end

     0   :  { %12 = vsyncpa [#allocation3], 0  ;;  %s552_s0 = inlined_call_operand.vmem [shape: f32[8,32], index: 0, kind: input, shape index: {}]   ;;  %s553_s1 = inlined_call_operand.hbm [shape: bf16[32,128], index: 1, kind: input, shape index: {}]   ;;  %s554_s2 = inlined_call_operand.vmem [shape: f32[1,128], index: 2, kind: input, shape index: {}]   ;;  %s555_s3 = inlined_call_operand.vmem [shape: bf16[128,128], index: 3, kind: input, shape index: {}]   ;;  %s556_s4 = inlined_call_operand.vmem [shape: f32[1,128], index: 4, kind: input, shape index: {}]   ;;  %s557_s5 = inlined_call_operand.vmem [shape: bf16[128,16], index: 5, kind: input, shape index: {}]   ;;  %s558_s6 = inlined_call_operand.vmem [shape: f32[1,16], index: 6, kind: input, shape index: {}]   ;;  %s559_s7 = inlined_call_operand.hbm [shape: f32[8,16], index: 7, kind: output, shape index: {}]  }
   0x1   :  { %13 = vsyncpa [#allocation4], 0  ;;  %s20_s26 = sshll.u32 %s553_s1, 4  ;;  %s442_s27 = smov [#allocation2]   ;;  %s21_s26 = int_to_ptr.hbm [resolvable:$true] %s20_s26 }
   0x2   :  { %s22_s28 = sshll.u32 %s442_s27, 4  ;;  %s443_s29 = smov 64   ;;  %s23_s28 = int_to_ptr.vmem [resolvable:$true] %s22_s28 }
   0x3   :  { %s444_s30 = smov 4  }
   0x4   :  { %28 = dma.hbm_to_vmem [thread:$0]  %s21_s26, 256, %s23_s28, [#allocation3], %s443_s29, %s443_s29, %s444_s30  }
   0x5   :  { %438 = dma.done.wait [#allocation3], 256  }
   0x6   :  { %439 = vsyncadd [#allocation3], 4294967040  ;;  %v362_v0 = vld [vmem:[#allocation2 + $0x8] sm:$0xff]  ;;  %v370_v1 = vld [vmem:[%s555_s3 + $0x38] sm:$0xff]  ;;  %vm66_vm0 = vcmask 261120   ;;  %vm268_vm4 = vcmask 130048  }
   0x7   :  { %76 = vmatpush.bf16.msra.mxu0 %v362_v0  ;;  %v361_v2 = vld [vmem:[#allocation2] sm:$0xff]  ;;  %153 = vmatpush.bf16.msra.mxu1 %v370_v1  ;;  %v369_v4 = vld [vmem:[%s555_s3 + $0x30] sm:$0xff]  ;;  %v368_v6 = vld [vmem:[%s555_s3 + $0x28] sm:$0xff] }
   0x8   :  { %v44_v3 = vld [vmem:[%s552_s0] sm:$0xff]  ;;  %v366_v8 = vld [vmem:[%s555_s3 + $0x18] sm:$0xff]  ;;  %v365_v9 = vld [vmem:[%s555_s3 + $0x10] sm:$0xff] }
   0x9   :  { %v45_v5 = vpack.c.bf16 %v44_v3, %v44_v3  ;;  %v367_v7 = vld [vmem:[%s555_s3 + $0x20] sm:$0xff]  ;;  %v364_v10 = vld [vmem:[%s555_s3 + $0x8] sm:$0xff]  ;;  %v378_v12 = vld [vmem:[%s557_s5 + $0x38] sm:$0xff] }
   0xa   :  { %v363_v11 = vld [vmem:[%s555_s3] sm:$0xff]  ;;  %236 = vmatpush.bf16.msra.mxu2 %v378_v12  ;;  %v377_v13 = vld [vmem:[%s557_s5 + $0x30] sm:$0xff]  ;;  %v376_v14 = vld [vmem:[%s557_s5 + $0x28] sm:$0xff] }
   0xb   :  { %77 = vmatpush.bf16.msra.mxu0 %v361_v2  ;;  %154 = vmatpush.bf16.msra.mxu1 %v369_v4  ;;  %v375_v15 = vld [vmem:[%s557_s5 + $0x20] sm:$0xff]  ;;  %v374_v16 = vld [vmem:[%s557_s5 + $0x18] sm:$0xff]  ;;  %v373_v17 = vld [vmem:[%s557_s5 + $0x10] sm:$0xff] }
   0xc   :  { %v383_v18 = vld [vmem:[%s554_s2] ss:$0 sm:$0xff]  ;;  %v372_v24 = vld [vmem:[%s557_s5 + $0x8] sm:$0xff] }
   0xd   :  { %v371_v25 = vld [vmem:[%s557_s5] sm:$0xff] }
   0xe   :  { %295 = vmatmul.msk.bf16.vlgmr.msra.gmra.mxu0 %vm66_vm0, %v45_v5  ;;  %237 = vmatpush.bf16.msra.mxu2 %v377_v13  ;;  %v384_v26 = vld [vmem:[%s556_s4] ss:$0 sm:$0xff]  ;;  %s445_s4 = smov [#allocation5]  }
   0xf   :  { %155 = vmatpush.bf16.msra.mxu1 %v368_v6  ;;  %v385_v32 = vld [vmem:[%s558_s6] ss:$0 sm:$0xff]  ;;  %s275_s5 = sshll.u32 %s445_s4, 4  ;;  %s277_s6 = sshll.u32 %s559_s7, 4  ;;  %s276_s5 = int_to_ptr.vmem [resolvable:$true] %s275_s5  ;;  %s278_s6 = int_to_ptr.hbm [resolvable:$true] %s277_s6 }
  0x12   :  { %238 = vmatpush.bf16.msra.mxu2 %v376_v14 }
  0x13   :  { %156 = vmatpush.bf16.msra.mxu1 %v367_v7 }
  0x16   :  { %239 = vmatpush.bf16.msra.mxu2 %v375_v15 }
  0x17   :  { %157 = vmatpush.bf16.msra.mxu1 %v366_v8 }
  0x1a   :  { %240 = vmatpush.bf16.msra.mxu2 %v374_v16 }
  0x1b   :  { %158 = vmatpush.bf16.msra.mxu1 %v365_v9 }
  0x1e   :  { %241 = vmatpush.bf16.msra.mxu2 %v373_v17 }
  0x1f   :  { %159 = vmatpush.bf16.msra.mxu1 %v364_v10 }
  0x22   :  { %242 = vmatpush.bf16.msra.mxu2 %v372_v24 }
  0x23   :  { %160 = vmatpush.bf16.msra.mxu1 %v363_v11 }
  0x26   :  { %243 = vmatpush.bf16.msra.mxu2 %v371_v25 }
  0x8b   :  { %v79_v19 = vpop.f32.mrf.mxu0 }
  0x8c   :  { %v80_v20 = vadd.f32 %v383_v18, %v79_v19 }
  0x8e   :  { %v83_v21 = vmax.f32 %v80_v20, 0.0 }
  0x90   :  { %v84_v22 = vpack.c.bf16 %v83_v21, %v83_v21 }
  0x92   :  { %161 = vmatmul.bf16.vlgmr.msra.gmra.mxu1 %v84_v22 }
  0x93   :  { %v81_v23 = vpop.f32.mrf.mxu0 }
 0x10f   :  { %v162_v27 = vpop.f32.mrf.mxu1 }
 0x110   :  { %v163_v28 = vadd.f32 %v384_v26, %v162_v27 }
 0x112   :  { %v166_v29 = vmax.f32 %v163_v28, 0.0 }
 0x114   :  { %v167_v30 = vpack.c.bf16 %v166_v29, %v166_v29 }
 0x116   :  { %244 = vmatmul.bf16.vlgmr.msra.gmra.mxu2 %v167_v30 }
 0x117   :  { %v164_v31 = vpop.f32.mrf.mxu1 }
 0x199   :  { %v245_v33 = vpop.f32.mrf.mxu2 }
 0x19a   :  { %v246_v34 = vadd.f32 %v385_v32, %v245_v33 }
 0x19c   :  { %v360_v35 = vmul.f32 -1.442695, %v246_v34 }
 0x19e   :  { %386 = vpow2.f32 %v360_v35 }
 0x1a1   :  { %v247_v36 = vpop.f32.mrf.mxu2 }
 0x1a4   :  { %v387_v37 = vpop.eup %386 }
 0x1a5   :  { %v252_v38 = vadd.f32 1.0, %v387_v37 }
 0x1a7   :  { %388 = vrcp.f32 %v252_v38  ;;  %v264_v42 = vand.u32 2147483648, %v252_v38  ;;  %v262_v44 = vand.u32 2147483647, %v252_v38  ;;  %vm258_vm2 = vweird.f32 %v252_v38 }
 0x1a9   :  { %v265_v46 = vor.u32 1.1754944e-38, %v264_v42  ;;  %vm263_vm5 = vcmp.eq.f32.partialorder %v262_v44, 8.507059e+37 }
 0x1ad   :  { %v389_v39 = vpop.eup %388 }
 0x1ae   :  { %v254_v40 = vmul.f32 %v389_v39, %v252_v38  ;;  %vm259_vm1 = vweird.f32 %v389_v39 }
 0x1af   :  { %vm260_vm3 = vmor %vm258_vm2, %vm259_vm1 }
 0x1b0   :  { %v255_v41 = vsub.f32 1.0, %v254_v40 }
 0x1b2   :  { %v256_v43 = vmul.f32 %v389_v39, %v255_v41 }
 0x1b4   :  { %v257_v45 = vadd.f32 %v389_v39, %v256_v43 }
 0x1b6   :  { %v261_v47 = vsel %vm260_vm3, %v389_v39, %v257_v45 }
 0x1b7   :  { %v266_v48 = vsel %vm263_vm5, %v265_v46, %v261_v47 }
 0x1b8   :  { %269 = vst.msk [vmem:[#allocation5] sm:$0xff] %vm268_vm4, %v266_v48 }
 0x1b9   :  { %280 = dma.vmem_to_hbm [thread:$0]  %s276_s5, 128, %s278_s6, [#allocation4]  }
 0x1ba   :  { %440 = dma.done.wait [#allocation4], 128  }
 0x1bb   :  { %441 = vsyncadd [#allocation4], 4294967168 }
 0x1bc   :  { %285 = vsyncpa [#allocation3], 1 }
 0x1bd   :  { %286 = vsyncpa [#allocation4], 1 }

</bundles_post_ra>
